<compile_context>
chip_gen: v5e
topology: v5e:2x2
jax: 0.10.0
libtpu: 0.0.40
codegen_flags: <defaults>
</compile_context>

<pallas_src>
import math

import jax
import jax.numpy as jnp
from jax.experimental import pallas as pl
from jax.experimental.pallas import tpu as pltpu

LANE = 128
F32B = 4


def _round_up(x: int, m: int) -> int:
    return ((x + m - 1) // m) * m


def _pad2(a, rows, cols):
    """Zero-pad a 2-D array to (rows, cols); no-op (no extra pass) if aligned."""
    r, c = a.shape
    if r == rows and c == cols:
        return a
    return jnp.pad(a, ((0, rows - r), (0, cols - c)))


def _vmem_budget_bytes() -> int:
    """~75% of per-core VMEM (~48 MiB on v7x, ~96 MiB on v5e/v6e)."""
    cap = 64 * 1024 * 1024
    try:
        cap = int(pltpu.get_tpu_info().vmem_capacity_bytes)
    except Exception:
        pass
    return (cap * 3) // 4


def _tile_candidates(n_pad: int):
    """Largest-first row-tile candidates that divide the padded N."""
    cands = [t for t in (512, 384, 256, 128) if n_pad % t == 0]
    return cands or [128]


# ---------------- kernel bodies ----------------

def _support_kernel(x_ref, w_ref, s_ref):
    # support row strip = X_strip @ W (weight block is constant -> resident).
    s_ref[...] = jnp.dot(x_ref[...], w_ref[...],
                         preferred_element_type=jnp.float32)


def _rowstrip_kernel(adj_ref, s_ref, o_ref):
    # out strip = adj_strip @ support (support fully VMEM-resident).
    o_ref[...] = jnp.dot(adj_ref[...], s_ref[...],
                         preferred_element_type=jnp.float32)


def _rowstrip_bias_kernel(adj_ref, s_ref, b_ref, o_ref):
    o_ref[...] = (jnp.dot(adj_ref[...], s_ref[...],
                          preferred_element_type=jnp.float32) + b_ref[...])


def _aggregate_kernel(adj_ref, s_ref, out_ref, acc_ref):
    # Fallback for very large N: out[i] = sum_k adj[i, k] @ support[k].
    k = pl.program_id(1)

    @pl.when(k == 0)
    def _init():
        acc_ref[...] = jnp.zeros_like(acc_ref)

    acc_ref[...] += jnp.dot(adj_ref[...], s_ref[...],
                            preferred_element_type=jnp.float32)

    @pl.when(k == pl.num_programs(1) - 1)
    def _finalize():
        out_ref[...] = acc_ref[...]


def _aggregate_bias_kernel(adj_ref, s_ref, b_ref, out_ref, acc_ref):
    k = pl.program_id(1)

    @pl.when(k == 0)
    def _init():
        acc_ref[...] = jnp.zeros_like(acc_ref)

    acc_ref[...] += jnp.dot(adj_ref[...], s_ref[...],
                            preferred_element_type=jnp.float32)

    @pl.when(k == pl.num_programs(1) - 1)
    def _finalize():
        out_ref[...] = acc_ref[...] + b_ref[...]


# ---------------- wrapper ----------------

def graph_convolution(x, adj, weight, bias=None, *, force_reduction_grid=False):
    """Pallas GCN forward.

    x: [N, F_in], adj: [N, N] dense, weight: [F_in, F_out], bias: [F_out] or None.
    Returns f32 [N, F_out].
    """
    N, f_in = x.shape
    f_in_w, f_out = weight.shape
    assert f_in_w == f_in, "weight rows must match input features"
    assert adj.shape == (N, N), "adj must be [N, N]"

    n_pad = _round_up(N, LANE)
    f_in_pad = _round_up(f_in, LANE)
    f_out_pad = _round_up(f_out, LANE)

    budget = _vmem_budget_bytes()
    row_cands = _tile_candidates(n_pad)

    # Pad operands only when needed (cheap ones separately from adj); all f32.
    x_p = _pad2(x.astype(jnp.float32), n_pad, f_in_pad)
    w_p = _pad2(weight.astype(jnp.float32), f_in_pad, f_out_pad)
    adj_p = _pad2(adj.astype(jnp.float32), n_pad, n_pad)
    bias_p = None
    if bias is not None:
        bias_p = _pad2(bias.astype(jnp.float32).reshape(1, f_out), 1, f_out_pad)

    # ---- kernel 1: support = X @ W (computed once, row-tiled, f32) ----
    row_tile_s = row_cands[0]
    support = pl.pallas_call(
        _support_kernel,
        out_shape=jax.ShapeDtypeStruct((n_pad, f_out_pad), jnp.float32),
        grid=(n_pad // row_tile_s,),
        in_specs=[
            pl.BlockSpec((row_tile_s, f_in_pad), lambda i: (i, 0)),
            pl.BlockSpec((f_in_pad, f_out_pad), lambda i: (0, 0)),
        ],
        out_specs=pl.BlockSpec((row_tile_s, f_out_pad), lambda i: (i, 0)),
        compiler_params=pltpu.CompilerParams(
            dimension_semantics=("parallel",),
            vmem_limit_bytes=budget,
        ),
    )(x_p, w_p)

    # ---- kernel 2: out = adj @ support (+ bias) ----
    # Fast path: resident support + (row_tile, n_pad) adj row strips, 1-D grid.
    support_bytes = 2 * n_pad * f_out_pad * F32B
    row_tile_fast = None
    for t in row_cands:
        need = (support_bytes
                + 2 * t * n_pad * F32B          # adj strip, double-buffered
                + 2 * t * f_out_pad * F32B      # output strip
                + (2 * f_out_pad * F32B if bias is not None else 0))
        if need <= budget:
            row_tile_fast = t
            break

    if row_tile_fast is not None and not force_reduction_grid:
        row_tile = row_tile_fast
        in_specs = [
            pl.BlockSpec((row_tile, n_pad), lambda i: (i, 0)),       # adj strip
            pl.BlockSpec((n_pad, f_out_pad), lambda i: (0, 0)),      # resident support
        ]
        operands = [adj_p, support]
        if bias is not None:
            in_specs.append(pl.BlockSpec((1, f_out_pad), lambda i: (0, 0)))
            operands.append(bias_p)
            kernel = _rowstrip_bias_kernel
        else:
            kernel = _rowstrip_kernel

        out_p = pl.pallas_call(
            kernel,
            out_shape=jax.ShapeDtypeStruct((n_pad, f_out_pad), jnp.float32),
            grid=(n_pad // row_tile,),
            in_specs=in_specs,
            out_specs=pl.BlockSpec((row_tile, f_out_pad), lambda i: (i, 0)),
            compiler_params=pltpu.CompilerParams(
                dimension_semantics=("parallel",),
                vmem_limit_bytes=budget,
            ),
        )(*operands)
    else:
        # Fallback for very large N: 2-D (rows, reduction) grid with an f32
        # accumulator; fat k blocks amortize the accumulator round-trip.
        row_tile = row_cands[0]
        k_cands = [t for t in (512, 256, 128) if n_pad % t == 0] or [128]
        k_tile = k_cands[0]

        in_specs = [
            pl.BlockSpec((row_tile, k_tile), lambda i, k: (i, k)),       # adj tile
            pl.BlockSpec((k_tile, f_out_pad), lambda i, k: (k, 0)),      # support tile
        ]
        operands = [adj_p, support]
        if bias is not None:
            in_specs.append(pl.BlockSpec((1, f_out_pad), lambda i, k: (0, 0)))
            operands.append(bias_p)
            kernel = _aggregate_bias_kernel
        else:
            kernel = _aggregate_kernel

        out_p = pl.pallas_call(
            kernel,
            out_shape=jax.ShapeDtypeStruct((n_pad, f_out_pad), jnp.float32),
            grid=(n_pad // row_tile, n_pad // k_tile),
            in_specs=in_specs,
            out_specs=pl.BlockSpec((row_tile, f_out_pad), lambda i, k: (i, 0)),
            scratch_shapes=[pltpu.VMEM((row_tile, f_out_pad), jnp.float32)],
            compiler_params=pltpu.CompilerParams(
                dimension_semantics=("parallel", "arbitrary"),
                vmem_limit_bytes=budget,
            ),
        )(*operands)

    return out_p[:N, :f_out]


if __name__ == "__main__":
    key = jax.random.PRNGKey(0)
    k_x, k_adj, k_w, k_b, k_x2, k_adj2 = jax.random.split(key, 6)

    # Module-consistent small shapes.
    N, in_features, out_features = 16, 32, 64

    # Parameter init mirroring reset_parameters(): uniform(-stdv, stdv),
    # stdv = 1/sqrt(out_features).
    stdv = 1.0 / math.sqrt(out_features)
    weight = jax.random.uniform(
        k_w, (in_features, out_features), dtype=jnp.float32,
        minval=-stdv, maxval=stdv)
    bias = jax.random.uniform(
        k_b, (out_features,), dtype=jnp.float32, minval=-stdv, maxval=stdv)

    # --- Case 1: small graph, with bias (fast path, padded N) ---
    x = jax.random.normal(k_x, (N, in_features), dtype=jnp.float32)
    adj_raw = jax.random.uniform(k_adj, (N, N), dtype=jnp.float32)
    adj = adj_raw / jnp.sum(adj_raw, axis=1, keepdims=True)

    out = jax.block_until_ready(graph_convolution(x, adj, weight, bias))
    ref = adj @ (x @ weight) + bias
    assert out.shape == (N, out_features)
    assert out.dtype == jnp.float32
    assert jnp.allclose(out, ref, atol=2e-2, rtol=2e-2), \
        "mismatch vs reference (bias case)"

    # --- Case 2: 384-node graph, no bias (fast path, 384-row strip, no adj pad) ---
    N2 = 384
    x2 = jax.random.normal(k_x2, (N2, in_features), dtype=jnp.float32)
    adj2_raw = jax.random.uniform(k_adj2, (N2, N2), dtype=jnp.float32)
    adj2 = adj2_raw / jnp.sum(adj2_raw, axis=1, keepdims=True)

    out2 = jax.block_until_ready(graph_convolution(x2, adj2, weight, bias=None))
    ref2 = adj2 @ (x2 @ weight)
    assert out2.shape == (N2, out_features)
    assert jnp.allclose(out2, ref2, atol=2e-2, rtol=2e-2), \
        "mismatch vs reference (no-bias case)"

    # --- Case 3: force the large-N (rows, reduction) fallback path, with bias ---
    out3 = jax.block_until_ready(
        graph_convolution(x2, adj2, weight, bias, force_reduction_grid=True))
    ref3 = adj2 @ (x2 @ weight) + bias
    assert out3.shape == (N2, out_features)
    assert jnp.allclose(out3, ref3, atol=2e-2, rtol=2e-2), \
        "mismatch vs reference (reduction-grid fallback)"

    print("KERNEL_OK")
</pallas_src>

<mosaic_0001>
module attributes {stable_mosaic.version = 11 : i64} {
  func.func @_support_kernel(%arg0: i32, %arg1: memref<128x128xf32, #tpu.memory_space<vmem>>, %arg2: memref<128x128xf32, #tpu.memory_space<vmem>>, %arg3: memref<128x128xf32, #tpu.memory_space<vmem>>) attributes {dimension_semantics = [#tpu.dimension_semantics<parallel>], iteration_bounds = array<i64: 1>, scalar_prefetch = 0 : i64, scratch_operands = 0 : i64, tpu.core_type = #tpu.core_type<tc>, window_params = [{transform_indices = @transform_0, window_bounds = array<i64: 128, 128>}, {pipeline_mode = #tpu.pipeline_mode<synchronous>, transform_indices = @transform_1, window_bounds = array<i64: 128, 128>}, {transform_indices = @transform_2, window_bounds = array<i64: 128, 128>}]} {
    %c0 = arith.constant 0 : index
    %c0_0 = arith.constant 0 : index
    %0 = vector.load %arg1[%c0, %c0_0] : memref<128x128xf32, #tpu.memory_space<vmem>>, vector<128x128xf32>
    %c0_1 = arith.constant 0 : index
    %c0_2 = arith.constant 0 : index
    %1 = vector.load %arg2[%c0_1, %c0_2] : memref<128x128xf32, #tpu.memory_space<vmem>>, vector<128x128xf32>
    %cst = arith.constant dense<0.000000e+00> : vector<128x128xf32>
    %2 = tpu.matmul %0, %1, %cst {dimension_numbers = #tpu.dot_dimension_numbers<[1], [0], [0], [1], [0, 0, 1, 1], [], []>} : vector<128x128xf32>, vector<128x128xf32>, vector<128x128xf32> -> vector<128x128xf32>
    %c0_3 = arith.constant 0 : index
    %c0_4 = arith.constant 0 : index
    %3 = vector.load %arg3[%c0_3, %c0_4] : memref<128x128xf32, #tpu.memory_space<vmem>>, vector<128x128xf32>
    tpu.vector_store %arg3[%c0_3, %c0_4], %2 {strides = array<i32>} : memref<128x128xf32, #tpu.memory_space<vmem>>, vector<128x128xf32>,
    return
  }
  func.func @transform_0(%arg0: i32) -> (i32, i32) {
    %c0_i32 = arith.constant 0 : i32
    %c0_i32_0 = arith.constant 0 : i32
    return %arg0, %c0_i32 : i32, i32
  }
  func.func @transform_1(%arg0: i32) -> (i32, i32) {
    %c0_i32 = arith.constant 0 : i32
    %c0_i32_0 = arith.constant 0 : i32
    %c0_i32_1 = arith.constant 0 : i32
    return %c0_i32, %c0_i32_0 : i32, i32
  }
  func.func @transform_2(%arg0: i32) -> (i32, i32) {
    %c0_i32 = arith.constant 0 : i32
    %c0_i32_0 = arith.constant 0 : i32
    return %arg0, %c0_i32 : i32, i32
  }
}

</mosaic_0001>

<bundles_post_ra>
// kernel: tpu_custom_call.1
= control target key start
LH: loop header
LB: loop body
LE: loop exit
PB: predicated region body
PF: predicated region fallthrough
CT: control target
= control target key end

     0   :  { %7 = vsyncpa [#allocation3], 0  ;;  %s346_s0 = inlined_call_operand.hbm [shape: f32[128,128], index: 0, kind: input, shape index: {}]   ;;  %s347_s1 = inlined_call_operand.hbm [shape: f32[128,128], index: 1, kind: input, shape index: {}]   ;;  %s348_s2 = inlined_call_operand.hbm [shape: f32[128,128], index: 2, kind: output, shape index: {}]  }
   0x1   :  { %8 = vsyncpa [#allocation6], 0 }
   0x2   :  { %9 = vsyncpa [#allocation4], 0  ;;  %s14_s11 = sshll.u32 %s346_s0, 4  ;;  %s308_s12 = smov [#allocation2]   ;;  %s15_s11 = int_to_ptr.hbm [resolvable:$true] %s14_s11 }
   0x3   :  { %s16_s13 = sshll.u32 %s308_s12, 4  ;;  %s27_s16 = sshll.u32 %s347_s1, 4  ;;  %s17_s13 = int_to_ptr.vmem [resolvable:$true] %s16_s13  ;;  %s28_s16 = int_to_ptr.hbm [resolvable:$true] %s27_s16 }
   0x4   :  { %s309_s17 = smov 128   ;;  %s310_s18 = smov 8  }
   0x5   :  { %22 = dma.hbm_to_vmem [thread:$0]  %s15_s11, 2048, %s17_s13, [#allocation3], %s309_s17, %s309_s17, %s310_s18  }
   0x6   :  { %s311_s19 = smov [#allocation5]  }
   0x7   :  { %s29_s20 = sshll.u32 %s311_s19, 4  ;;  %s30_s20 = int_to_ptr.vmem [resolvable:$true] %s29_s20 }
   0x8   :  { %35 = dma.hbm_to_vmem [thread:$0]  %s28_s16, 2048, %s30_s20, [#allocation6], %s309_s17, %s309_s17, %s310_s18  }
   0x9   :  { %302 = dma.done.wait [#allocation3], 2048  }
   0xa   :  { %303 = vsyncadd [#allocation3], 4294965248 }
   0xb   :  { %304 = dma.done.wait [#allocation6], 2048  }
   0xc   :  { %305 = vsyncadd [#allocation6], 4294965248  ;;  %v75_v0 = vld [vmem:[#allocation5 + $0x78] sm:$0xff]  ;;  %v74_v1 = vld [vmem:[#allocation5 + $0x70] sm:$0xff]  ;;  %s312_s0 = smov [#allocation7]   ;;  %s163_s23 = sshll.u32 %s348_s2, 4  ;;  %s164_s23 = int_to_ptr.hbm [resolvable:$true] %s163_s23 }
   0xd   :  { %178 = vmatpush.msra.mxu2 %v75_v0  ;;  %179 = vmatpush.msra.mxu3 %v75_v0  ;;  %v73_v2 = vld [vmem:[#allocation5 + $0x68] sm:$0xff]  ;;  %v72_v3 = vld [vmem:[#allocation5 + $0x60] sm:$0xff]  ;;  %v71_v4 = vld [vmem:[#allocation5 + $0x58] sm:$0xff]  ;;  %s161_s1 = sshll.u32 %s312_s0, 4  ;;  %s162_s1 = int_to_ptr.vmem [resolvable:$true] %s161_s1 }
   0xe   :  { %76 = vmatpush.msra.mxu0 %v75_v0  ;;  %177 = vmatpush.msra.mxu1 %v75_v0  ;;  %v70_v5 = vld [vmem:[#allocation5 + $0x50] sm:$0xff]  ;;  %v69_v6 = vld [vmem:[#allocation5 + $0x48] sm:$0xff]  ;;  %v68_v7 = vld [vmem:[#allocation5 + $0x40] sm:$0xff] }
   0xf   :  { %181 = vmatpush.msra.mxu2 %v74_v1  ;;  %182 = vmatpush.msra.mxu3 %v74_v1  ;;  %v67_v8 = vld [vmem:[#allocation5 + $0x38] sm:$0xff]  ;;  %v66_v9 = vld [vmem:[#allocation5 + $0x30] sm:$0xff]  ;;  %v65_v10 = vld [vmem:[#allocation5 + $0x28] sm:$0xff] }
  0x10   :  { %77 = vmatpush.msra.mxu0 %v74_v1  ;;  %180 = vmatpush.msra.mxu1 %v74_v1  ;;  %v64_v11 = vld [vmem:[#allocation5 + $0x20] sm:$0xff]  ;;  %v63_v12 = vld [vmem:[#allocation5 + $0x18] sm:$0xff]  ;;  %v62_v13 = vld [vmem:[#allocation5 + $0x10] sm:$0xff] }
  0x11   :  { %184 = vmatpush.msra.mxu2 %v73_v2  ;;  %185 = vmatpush.msra.mxu3 %v73_v2  ;;  %v61_v14 = vld [vmem:[#allocation5 + $0x8] sm:$0xff]  ;;  %v60_v15 = vld [vmem:[#allocation5] sm:$0xff]  ;;  %v54_v24 = vld [vmem:[#allocation2 + $0x50] sm:$0xff] }
  0x12   :  { %78 = vmatpush.msra.mxu0 %v73_v2  ;;  %183 = vmatpush.msra.mxu1 %v73_v2  ;;  %v52_v16 = vld [vmem:[#allocation2 + $0x40] sm:$0xff]  ;;  %v53_v20 = vld [vmem:[#allocation2 + $0x48] sm:$0xff]  ;;  %v58_v25 = vld [vmem:[#allocation2 + $0x70] sm:$0xff] }
  0x13   :  { %187 = vmatpush.msra.mxu2 %v72_v3  ;;  %188 = vmatpush.msra.mxu3 %v72_v3  ;;  %v56_v17 = vld [vmem:[#allocation2 + $0x60] sm:$0xff]  ;;  %v57_v21 = vld [vmem:[#allocation2 + $0x68] sm:$0xff]  ;;  %v46_v26 = vld [vmem:[#allocation2 + $0x10] sm:$0xff] }
  0x14   :  { %79 = vmatpush.msra.mxu0 %v72_v3  ;;  %186 = vmatpush.msra.mxu1 %v72_v3  ;;  %v44_v18 = vld [vmem:[#allocation2] sm:$0xff]  ;;  %v45_v22 = vld [vmem:[#allocation2 + $0x8] sm:$0xff]  ;;  %v50_v27 = vld [vmem:[#allocation2 + $0x30] sm:$0xff] }
  0x15   :  { %190 = vmatpush.msra.mxu2 %v71_v4  ;;  %191 = vmatpush.msra.mxu3 %v71_v4  ;;  %v48_v19 = vld [vmem:[#allocation2 + $0x20] sm:$0xff]  ;;  %v49_v23 = vld [vmem:[#allocation2 + $0x28] sm:$0xff]  ;;  %v55_v28 = vld [vmem:[#allocation2 + $0x58] sm:$0xff] }
  0x16   :  { %80 = vmatpush.msra.mxu0 %v71_v4  ;;  %189 = vmatpush.msra.mxu1 %v71_v4  ;;  %v59_v29 = vld [vmem:[#allocation2 + $0x78] sm:$0xff] }
  0x17   :  { %193 = vmatpush.msra.mxu2 %v70_v5  ;;  %194 = vmatpush.msra.mxu3 %v70_v5  ;;  %v47_v30 = vld [vmem:[#allocation2 + $0x18] sm:$0xff] }
  0x18   :  { %81 = vmatpush.msra.mxu0 %v70_v5  ;;  %192 = vmatpush.msra.mxu1 %v70_v5  ;;  %v51_v31 = vld [vmem:[#allocation2 + $0x38] sm:$0xff] }
  0x19   :  { %196 = vmatpush.msra.mxu2 %v69_v6  ;;  %197 = vmatpush.msra.mxu3 %v69_v6 }
  0x1a   :  { %82 = vmatpush.msra.mxu0 %v69_v6  ;;  %195 = vmatpush.msra.mxu1 %v69_v6 }
  0x1b   :  { %199 = vmatpush.msra.mxu2 %v68_v7  ;;  %200 = vmatpush.msra.mxu3 %v68_v7 }
  0x1c   :  { %83 = vmatpush.msra.mxu0 %v68_v7  ;;  %198 = vmatpush.msra.mxu1 %v68_v7 }
  0x1d   :  { %202 = vmatpush.msra.mxu2 %v67_v8  ;;  %203 = vmatpush.msra.mxu3 %v67_v8 }
  0x1e   :  { %84 = vmatpush.msra.mxu0 %v67_v8  ;;  %201 = vmatpush.msra.mxu1 %v67_v8 }
  0x1f   :  { %205 = vmatpush.msra.mxu2 %v66_v9  ;;  %206 = vmatpush.msra.mxu3 %v66_v9 }
  0x20   :  { %85 = vmatpush.msra.mxu0 %v66_v9  ;;  %204 = vmatpush.msra.mxu1 %v66_v9 }
  0x21   :  { %208 = vmatpush.msra.mxu2 %v65_v10  ;;  %209 = vmatpush.msra.mxu3 %v65_v10 }
  0x22   :  { %86 = vmatpush.msra.mxu0 %v65_v10  ;;  %207 = vmatpush.msra.mxu1 %v65_v10 }
  0x23   :  { %211 = vmatpush.msra.mxu2 %v64_v11  ;;  %212 = vmatpush.msra.mxu3 %v64_v11 }
  0x24   :  { %87 = vmatpush.msra.mxu0 %v64_v11  ;;  %210 = vmatpush.msra.mxu1 %v64_v11 }
  0x25   :  { %214 = vmatpush.msra.mxu2 %v63_v12  ;;  %215 = vmatpush.msra.mxu3 %v63_v12 }
  0x26   :  { %88 = vmatpush.msra.mxu0 %v63_v12  ;;  %213 = vmatpush.msra.mxu1 %v63_v12 }
  0x27   :  { %217 = vmatpush.msra.mxu2 %v62_v13  ;;  %218 = vmatpush.msra.mxu3 %v62_v13 }
  0x28   :  { %89 = vmatpush.msra.mxu0 %v62_v13  ;;  %216 = vmatpush.msra.mxu1 %v62_v13 }
  0x29   :  { %220 = vmatpush.msra.mxu2 %v61_v14  ;;  %221 = vmatpush.msra.mxu3 %v61_v14 }
  0x2a   :  { %90 = vmatpush.msra.mxu0 %v61_v14  ;;  %219 = vmatpush.msra.mxu1 %v61_v14 }
  0x2b   :  { %223 = vmatpush.msra.mxu2 %v60_v15  ;;  %224 = vmatpush.msra.mxu3 %v60_v15 }
  0x2c   :  { %116 = vmatmul.f32.vlgmr.msra.gmra.mxu2 %v52_v16  ;;  %128 = vmatmul.f32.vlgmr.msra.gmra.mxu3 %v56_v17 }
  0x2d   :  { %91 = vmatpush.msra.mxu0 %v60_v15  ;;  %222 = vmatpush.msra.mxu1 %v60_v15 }
  0x2e   :  { %92 = vmatmul.f32.vlgmr.msra.gmra.mxu0 %v44_v18  ;;  %104 = vmatmul.f32.vlgmr.msra.gmra.mxu1 %v48_v19 }
  0x34   :  { %119 = vmatmul.f32.gmra.mxu2 %v53_v20  ;;  %131 = vmatmul.f32.gmra.mxu3 %v57_v21 }
  0x36   :  { %95 = vmatmul.f32.gmra.mxu0 %v45_v22  ;;  %107 = vmatmul.f32.gmra.mxu1 %v49_v23 }
  0x3c   :  { %122 = vmatmul.f32.gmra.mxu2 %v54_v24  ;;  %134 = vmatmul.f32.gmra.mxu3 %v58_v25 }
  0x3e   :  { %98 = vmatmul.f32.gmra.mxu0 %v46_v26  ;;  %110 = vmatmul.f32.gmra.mxu1 %v50_v27 }
  0x44   :  { %125 = vmatmul.f32.gmra.mxu2 %v55_v28  ;;  %137 = vmatmul.f32.gmra.mxu3 %v59_v29 }
  0x46   :  { %101 = vmatmul.f32.gmra.mxu0 %v47_v30  ;;  %113 = vmatmul.f32.gmra.mxu1 %v51_v31 }
  0xab   :  { %v93_v32 = vpop.f32.mrf.mxu0  ;;  %v105_v33 = vpop.f32.mrf.mxu1 }
  0xac   :  { %141 = vst [vmem:[#allocation7] sm:$0xff] %v93_v32 }
  0xad   :  { %145 = vst [vmem:[#allocation7 + $0x20] sm:$0xff] %v105_v33 }
  0xaf   :  { %v117_v34 = vpop.f32.mrf.mxu2  ;;  %v129_v35 = vpop.f32.mrf.mxu3 }
  0xb0   :  { %149 = vst [vmem:[#allocation7 + $0x40] sm:$0xff] %v117_v34 }
  0xb1   :  { %153 = vst [vmem:[#allocation7 + $0x60] sm:$0xff] %v129_v35 }
  0xb3   :  { %v96_v36 = vpop.f32.mrf.mxu0  ;;  %v108_v37 = vpop.f32.mrf.mxu1 }
  0xb4   :  { %142 = vst [vmem:[#allocation7 + $0x8] sm:$0xff] %v96_v36 }
  0xb5   :  { %146 = vst [vmem:[#allocation7 + $0x28] sm:$0xff] %v108_v37 }
  0xb7   :  { %v120_v38 = vpop.f32.mrf.mxu2  ;;  %v132_v39 = vpop.f32.mrf.mxu3 }
  0xb8   :  { %150 = vst [vmem:[#allocation7 + $0x48] sm:$0xff] %v120_v38 }
  0xb9   :  { %154 = vst [vmem:[#allocation7 + $0x68] sm:$0xff] %v132_v39 }
  0xbb   :  { %v99_v40 = vpop.f32.mrf.mxu0  ;;  %v111_v41 = vpop.f32.mrf.mxu1 }
  0xbc   :  { %143 = vst [vmem:[#allocation7 + $0x10] sm:$0xff] %v99_v40 }
  0xbd   :  { %147 = vst [vmem:[#allocation7 + $0x30] sm:$0xff] %v111_v41 }
  0xbf   :  { %v123_v42 = vpop.f32.mrf.mxu2  ;;  %v135_v43 = vpop.f32.mrf.mxu3 }
  0xc0   :  { %151 = vst [vmem:[#allocation7 + $0x50] sm:$0xff] %v123_v42 }
  0xc1   :  { %155 = vst [vmem:[#allocation7 + $0x70] sm:$0xff] %v135_v43 }
  0xc3   :  { %v102_v44 = vpop.f32.mrf.mxu0  ;;  %v114_v45 = vpop.f32.mrf.mxu1 }
  0xc4   :  { %144 = vst [vmem:[#allocation7 + $0x18] sm:$0xff] %v102_v44 }
  0xc5   :  { %148 = vst [vmem:[#allocation7 + $0x38] sm:$0xff] %v114_v45 }
  0xc7   :  { %v126_v46 = vpop.f32.mrf.mxu2  ;;  %v138_v47 = vpop.f32.mrf.mxu3 }
  0xc8   :  { %152 = vst [vmem:[#allocation7 + $0x58] sm:$0xff] %v126_v46 }
  0xc9   :  { %156 = vst [vmem:[#allocation7 + $0x78] sm:$0xff] %v138_v47 }
  0xca   :  { %169 = dma.vmem_to_hbm [thread:$0]  %s162_s1, 2048, %s164_s23, [#allocation4], %s309_s17, %s309_s17, %s310_s18  }
  0xcb   :  { %306 = dma.done.wait [#allocation4], 2048  }
  0xcc   :  { %307 = vsyncadd [#allocation4], 4294965248 }
  0xcd   :  { %174 = vsyncpa [#allocation3], 1 }
  0xce   :  { %175 = vsyncpa [#allocation6], 1 }
  0xcf   :  { %176 = vsyncpa [#allocation4], 1 }

</bundles_post_ra>
